<compile_context>
chip_gen: v7x
topology: tpu7x:2x2x1
jax: 0.10.0
libtpu: 0.0.40
codegen_flags: <defaults>
</compile_context>

<pallas_src>
import functools
import math

import jax
import jax.numpy as jnp
from jax.experimental import pallas as pl
from jax.experimental.pallas import tpu as pltpu

LANE = 128
_EPS = 1e-6
# Streaming blocks: ~1M f32 elements (4 MiB) per block -> near HBM roofline.
_BLOCK_ELEMS = 1024 * 1024


def _round_up(x, m):
    return -(-x // m) * m


@functools.lru_cache(maxsize=None)
def _vmem_budgets():
    """(fused_limit, group_budget, call_limit) bytes, per TPU generation."""
    try:
        phys = int(pltpu.get_tpu_info().vmem_capacity_bytes)
    except Exception:  # unknown backend: be conservative (v7x-like)
        phys = 64 * 1024 * 1024
    if phys >= 96 * 1024 * 1024:           # v5e / v6e: 128 MiB physical VMEM
        call_limit = 64 * 1024 * 1024
        fused_limit = 22 * 1024 * 1024     # padded per-image (in + out fit)
    else:                                   # v7x: 64 MiB physical VMEM
        call_limit = 40 * 1024 * 1024
        fused_limit = 12 * 1024 * 1024
    # Max sum of padded input bytes per variadic fused call (outputs double it).
    group_budget = (call_limit - (8 << 20)) // 2
    return fused_limit, group_budget, call_limit


def _best_2d_view(n):
    """Pick (rows, width) with rows*width == n; lane-dense width if possible."""
    for w in (4096, 2048, 1024, 512, 256, 128):
        if n % w == 0:
            return n // w, w
    for w in range(min(n, 1024), 0, -1):   # odd sizes (rare), trace-time only
        if n % w == 0:
            return n // w, w
    return 1, n  # unreachable


def _padded_bytes(rows, width):
    return _round_up(max(rows, 1), 8) * _round_up(width, LANE) * 4


# ----------------------------------------------------------------------------
# Fused kernel (small arrays): min/max + normalize for K images, all resident
# in VMEM, in ONE pallas_call (no grid, no stacking copies).
# ----------------------------------------------------------------------------
def _fused_minmax_normalize_kernel(*refs):
    k = len(refs) // 2
    for x_ref, o_ref in zip(refs[:k], refs[k:]):
        x = x_ref[...]
        mn = jnp.min(x)
        mx = jnp.max(x)
        o_ref[...] = ((x - mn) * (1.0 / (mx - mn + _EPS))).astype(o_ref.dtype)


def _normalize_fused_multi(views):
    _, _, call_limit = _vmem_budgets()
    outs = pl.pallas_call(
        _fused_minmax_normalize_kernel,
        out_shape=tuple(jax.ShapeDtypeStruct(v.shape, jnp.float32)
                        for v in views),
        compiler_params=pltpu.CompilerParams(vmem_limit_bytes=call_limit),
    )(*views)
    if not isinstance(outs, (list, tuple)):
        outs = (outs,)
    return list(outs)


# ----------------------------------------------------------------------------
# Streaming kernels (large arrays): pass 1 = per-core partial min/max with a
# small (8, width) accumulator; pass 2 = elementwise normalize (SMEM scalars).
# ----------------------------------------------------------------------------
def _minmax_stream_kernel(x_ref, mn_ref, mx_ref, mn_acc, mx_acc, *,
                          rows_last, total_blocks, core_stride, exact):
    j = pl.program_id(1)

    @pl.when(j == 0)
    def _():
        mn_acc[...] = jnp.full(mn_acc.shape, jnp.inf, jnp.float32)
        mx_acc[...] = jnp.full(mx_acc.shape, -jnp.inf, jnp.float32)

    x = x_ref[...]
    width = x.shape[-1]

    def fold(lo, hi):
        # Fold the block into the (8, width) accumulator: pure elementwise VPU
        # min/max across sublane groups (no XLU until the finalize).
        lo = lo.reshape(-1, 8, width)
        hi = hi.reshape(-1, 8, width)
        mn_acc[...] = jnp.minimum(mn_acc[...], jnp.min(lo, axis=0))
        mx_acc[...] = jnp.maximum(mx_acc[...], jnp.max(hi, axis=0))

    if exact:
        fold(x, x)
    else:
        # Masking hoisted: only the (single) partial last block pays for it.
        blk = pl.program_id(0) * core_stride + j
        is_last = blk == total_blocks - 1

        @pl.when(jnp.logical_not(is_last))
        def _():
            fold(x, x)

        @pl.when(is_last)
        def _():
            rid = jax.lax.broadcasted_iota(jnp.int32, x.shape, 0)
            valid = rid < rows_last
            fold(jnp.where(valid, x, jnp.inf), jnp.where(valid, x, -jnp.inf))

    # Finalize: one cross-lane reduce per core; partials land in rows 0 / 8.
    @pl.when(j == pl.num_programs(1) - 1)
    def _():
        mn_ref[...] = jnp.full(mn_ref.shape, jnp.min(mn_acc[...]), jnp.float32)
        mx_ref[...] = jnp.full(mx_ref.shape, jnp.max(mx_acc[...]), jnp.float32)


def _normalize_stream_kernel(mn_ref, mx_ref, x_ref, o_ref):
    # Combine the two per-core partials (scalar SMEM reads, negligible/step).
    mn = jnp.minimum(mn_ref[0, 0], mn_ref[8, 0])
    mx = jnp.maximum(mx_ref[0, 0], mx_ref[8, 0])
    scale = 1.0 / (mx - mn + _EPS)
    o_ref[...] = ((x_ref[...] - mn) * scale).astype(o_ref.dtype)


def _normalize_streaming(x2):
    _, _, call_limit = _vmem_budgets()
    m, width = x2.shape
    block_rows = max(8, (_BLOCK_ELEMS // width) // 8 * 8)
    block_rows = min(block_rows, max(8, (m // 8) * 8))
    total_blocks = pl.cdiv(m, block_rows)
    exact = (m % block_rows == 0)
    rows_last = m - (total_blocks - 1) * block_rows
    # 2-way split of the block range across TensorCores (v7x megacore);
    # an overlap of <= 1 block when total_blocks is odd is min/max-safe.
    half = pl.cdiv(total_blocks, 2)
    core_stride = total_blocks - half

    part_mn, part_mx = pl.pallas_call(
        functools.partial(_minmax_stream_kernel, rows_last=rows_last,
                          total_blocks=total_blocks, core_stride=core_stride,
                          exact=exact),
        out_shape=(jax.ShapeDtypeStruct((16, 1), jnp.float32),
                   jax.ShapeDtypeStruct((16, 1), jnp.float32)),
        grid=(2, half),
        in_specs=[pl.BlockSpec((block_rows, width),
                               lambda c, j: (c * core_stride + j, 0))],
        out_specs=(pl.BlockSpec((8, 1), lambda c, j: (c, 0)),
                   pl.BlockSpec((8, 1), lambda c, j: (c, 0))),
        scratch_shapes=[pltpu.VMEM((8, width), jnp.float32),
                        pltpu.VMEM((8, width), jnp.float32)],
        compiler_params=pltpu.CompilerParams(
            dimension_semantics=("parallel", "arbitrary"),
            vmem_limit_bytes=call_limit),
    )(x2)

    y2 = pl.pallas_call(
        _normalize_stream_kernel,
        out_shape=jax.ShapeDtypeStruct(x2.shape, jnp.float32),
        grid=(total_blocks,),
        in_specs=[
            pl.BlockSpec(memory_space=pltpu.MemorySpace.SMEM),
            pl.BlockSpec(memory_space=pltpu.MemorySpace.SMEM),
            pl.BlockSpec((block_rows, width), lambda i: (i, 0)),
        ],
        out_specs=pl.BlockSpec((block_rows, width), lambda i: (i, 0)),
        compiler_params=pltpu.CompilerParams(
            dimension_semantics=("parallel",),
            vmem_limit_bytes=call_limit),
    )(part_mn, part_mx, x2)
    return y2


# ----------------------------------------------------------------------------
# Dispatch: (x - min) / (max - min + 1e-6), batching same-call-eligible images.
# ----------------------------------------------------------------------------
def _normalize_one_large(x):
    orig_shape = x.shape
    n = x.size
    flat = x.reshape(-1)                         # contiguous reshape: no copy
    if n % LANE == 0:
        rows, width = _best_2d_view(n)
        return _normalize_streaming(flat.reshape(rows, width)).reshape(orig_shape)
    # TODO(synk): rare ragged case (large tensor, size not a multiple of 128):
    # edge-pad with real data (one extra HBM copy), stream, slice back.
    pad = _round_up(n, LANE) - n
    padded = jnp.concatenate([flat, jnp.full((pad,), flat[0], flat.dtype)])
    rows, width = _best_2d_view(padded.shape[0])
    y = _normalize_streaming(padded.reshape(rows, width))
    return y.reshape(-1)[:n].reshape(orig_shape)


def _normalize_many(named_images):
    """Normalize a list of (name, image); VMEM-sized images share launches."""
    fused_limit, group_budget, _ = _vmem_budgets()
    out = {}
    eligible = []
    for name, img in named_images:
        x = jnp.asarray(img, jnp.float32)
        rows, width = _best_2d_view(x.size)
        pbytes = _padded_bytes(rows, width)
        if pbytes <= fused_limit:
            eligible.append((name, x, x.reshape(rows, width), pbytes))
        else:
            out[name] = _normalize_one_large(x)
    # Greedy-pack eligible images into as few variadic fused calls as the
    # per-call VMEM budget allows (one call for the whole MSCMR forward).
    groups = []
    for item in eligible:
        for g in groups:
            if g[0] + item[3] <= group_budget:
                g[0] += item[3]
                g[1].append(item)
                break
        else:
            groups.append([item[3], [item]])
    for _, members in groups:
        ys = _normalize_fused_multi([m[2] for m in members])
        for (name, x, _, _), y in zip(members, ys):
            out[name] = y.reshape(x.shape)
    return out


def minmax_normalize(image):
    return _normalize_many([("x", jnp.asarray(image, jnp.float32))])["x"]


# ----------------------------------------------------------------------------
# Plain-JAX glue: torchvision.utils.make_grid(nrow=4, padding=2, pad_value=1),
# vectorized (pad -> reshape -> transpose; no per-image update-slice chain).
# ----------------------------------------------------------------------------
def make_grid(image, nrow=4, padding=2, pad_value=1.0):
    b, c, h, w = image.shape
    if c == 1:                       # torchvision replicates 1 channel -> 3
        image = jnp.broadcast_to(image, (b, 3, h, w))
        c = 3
    xmaps = min(nrow, b)
    ymaps = int(math.ceil(b / xmaps))
    total = ymaps * xmaps
    if total > b:
        filler = jnp.full((total - b, c, h, w), pad_value, image.dtype)
        image = jnp.concatenate([image, filler], axis=0)
    cells = jnp.pad(image, ((0, 0), (0, 0), (padding, 0), (padding, 0)),
                    constant_values=pad_value)
    hh, ww = h + padding, w + padding
    grid = cells.reshape(ymaps, xmaps, c, hh, ww)
    grid = grid.transpose(2, 0, 3, 1, 4).reshape(c, ymaps * hh, xmaps * ww)
    return jnp.pad(grid, ((0, 0), (0, padding), (0, padding)),
                   constant_values=pad_value)


def _normalize_and_grid(image):
    return make_grid(minmax_normalize(image), nrow=4, pad_value=1.0)


@jax.jit
def _forward(originals, inputs, outputs, ori_labels, labels):
    named = [
        ("inputs_original", jnp.asarray(originals, jnp.float32)),
        ("inputs_train", jnp.asarray(inputs, jnp.float32)),
        ("outputs_train", jnp.asarray(outputs, jnp.float32)),
        ("labels_original", jnp.asarray(ori_labels, jnp.float32)),
        ("labels_train", jnp.asarray(labels, jnp.float32)),
    ]
    normalized = _normalize_many(named)
    # Grids stay float32 for fidelity with the PyTorch reference; switching
    # the out dtype to bfloat16 would halve store traffic for TB-only use.
    return {name: make_grid(img, nrow=4, pad_value=1.0)
            for name, img in normalized.items()}


class VisualizeTrain:
    """JAX/Pallas port of Visualize_train (no trainable parameters)."""

    def save_image(self, image, tag, epoch, writer):
        grid = _normalize_and_grid(image)
        # TODO(synk): writer.add_image(tag, grid, epoch) is TensorBoard host
        # I/O with no Pallas/JAX-device equivalent; the grid is returned.
        return grid

    def __call__(self, originals, inputs, outputs, ori_labels, labels,
                 epoch, writer=None):
        return _forward(originals, inputs, outputs, ori_labels, labels)


if __name__ == "__main__":
    key = jax.random.PRNGKey(0)
    k0, k1, k2, k3, k4, k5, k6, k7 = jax.random.split(key, 8)

    # Small shapes consistent with the MSCMR segmentation setting.
    originals = jax.random.normal(k0, (2, 1, 16, 16), dtype=jnp.float32)
    inputs = jax.random.normal(k1, (2, 1, 16, 16), dtype=jnp.float32)
    outputs = jax.random.normal(k2, (2, 4, 16, 16), dtype=jnp.float32)
    ori_labels = jax.random.randint(k3, (2, 1, 16, 16), 0, 4, dtype=jnp.int32)
    labels = jax.random.uniform(k4, (2, 4, 16, 16), dtype=jnp.float32)

    viz = VisualizeTrain()
    grids = viz(originals, inputs, outputs, ori_labels, labels,
                epoch=0, writer=None)
    grids = jax.block_until_ready(grids)

    def ref_norm(a):
        a = a.astype(jnp.float32)
        return (a - a.min()) / (a.max() - a.min() + 1e-6)

    # Full forward (single batched fused Pallas call) vs pure-JAX reference.
    for name, img in [("inputs_original", originals), ("inputs_train", inputs),
                      ("outputs_train", outputs),
                      ("labels_original", ori_labels),
                      ("labels_train", labels)]:
        ref = make_grid(ref_norm(img), nrow=4, pad_value=1.0)
        assert jnp.allclose(grids[name], ref, atol=1e-5), name

    # Streaming path, exercised directly so it also compiles/runs on TPU:
    #  (a) multi-block exact tiling + 2-way core split,
    big = jax.random.normal(k5, (4, 4, 512, 512), dtype=jnp.float32)
    got = _normalize_streaming(big.reshape(-1, 4096)).reshape(big.shape)
    assert jnp.allclose(got, ref_norm(big), atol=1e-5)

    #  (b) multi-block with masked partial last block (+1-block core overlap),
    mid = jax.random.normal(k6, (2, 3, 640, 640), dtype=jnp.float32)
    got = _normalize_streaming(mid.reshape(-1, 4096)).reshape(mid.shape)
    assert jnp.allclose(got, ref_norm(mid), atol=1e-5)

    #  (c) small odd row count (block_rows capped to <= rows, masked tail).
    odd = jax.random.normal(k7, (3, 1, 320, 320), dtype=jnp.float32)
    r, w = _best_2d_view(odd.size)
    got = _normalize_streaming(odd.reshape(r, w)).reshape(odd.shape)
    assert jnp.allclose(got, ref_norm(odd), atol=1e-5)

    print("KERNEL_OK")
</pallas_src>

<mosaic_0001>
module attributes {stable_mosaic.version = 11 : i64} {
  func.func @_fused_minmax_normalize_kernel(%arg0: memref<1x512xf32, #tpu.memory_space<vmem>>, %arg1: memref<1x512xf32, #tpu.memory_space<vmem>>, %arg2: memref<1x2048xf32, #tpu.memory_space<vmem>>, %arg3: memref<1x512xf32, #tpu.memory_space<vmem>>, %arg4: memref<1x2048xf32, #tpu.memory_space<vmem>>, %arg5: memref<1x512xf32, #tpu.memory_space<vmem>>, %arg6: memref<1x512xf32, #tpu.memory_space<vmem>>, %arg7: memref<1x2048xf32, #tpu.memory_space<vmem>>, %arg8: memref<1x512xf32, #tpu.memory_space<vmem>>, %arg9: memref<1x2048xf32, #tpu.memory_space<vmem>>) attributes {dimension_semantics = [], scalar_prefetch = 0 : i64, scratch_operands = 0 : i64, tpu.core_type = #tpu.core_type<tc>} {
    %c0 = arith.constant 0 : index
    %c0_0 = arith.constant 0 : index
    %0 = vector.load %arg0[%c0, %c0_0] : memref<1x512xf32, #tpu.memory_space<vmem>>, vector<1x512xf32>
    %1 = vector.shape_cast %0 : vector<1x512xf32> to vector<1x1x512xf32>
    %cst = arith.constant dense<0x7F800000> : vector<1xf32>
    %2 = vector.multi_reduction <minimumf>, %1, %cst [1, 2] : vector<1x1x512xf32> to vector<1xf32>
    %3 = vector.shape_cast %2 : vector<1xf32> to vector<1x1x1xf32>
    %4 = vector.extract %3[0, 0, 0] : f32 from vector<1x1x1xf32>
    %5 = vector.shape_cast %0 : vector<1x512xf32> to vector<1x1x512xf32>
    %cst_1 = arith.constant dense<0xFF800000> : vector<1xf32>
    %6 = vector.multi_reduction <maximumf>, %5, %cst_1 [1, 2] : vector<1x1x512xf32> to vector<1xf32>
    %7 = vector.shape_cast %6 : vector<1xf32> to vector<1x1x1xf32>
    %8 = vector.extract %7[0, 0, 0] : f32 from vector<1x1x1xf32>
    %9 = vector.broadcast %4 : f32 to vector<1x512xf32>
    %10 = arith.subf %0, %9 : vector<1x512xf32>
    %11 = arith.subf %8, %4 : f32
    %cst_2 = arith.constant 9.99999997E-7 : f32
    %12 = arith.addf %11, %cst_2 : f32
    %cst_3 = arith.constant 1.000000e+00 : f32
    %13 = arith.divf %cst_3, %12 : f32
    %14 = vector.broadcast %13 : f32 to vector<1x512xf32>
    %15 = arith.mulf %10, %14 : vector<1x512xf32>
    %c0_4 = arith.constant 0 : index
    %c0_5 = arith.constant 0 : index
    %16 = vector.load %arg5[%c0_4, %c0_5] : memref<1x512xf32, #tpu.memory_space<vmem>>, vector<1x512xf32>
    tpu.vector_store %arg5[%c0_4, %c0_5], %15 {strides = array<i32>} : memref<1x512xf32, #tpu.memory_space<vmem>>, vector<1x512xf32>,
    %c0_6 = arith.constant 0 : index
    %c0_7 = arith.constant 0 : index
    %17 = vector.load %arg1[%c0_6, %c0_7] : memref<1x512xf32, #tpu.memory_space<vmem>>, vector<1x512xf32>
    %18 = vector.shape_cast %17 : vector<1x512xf32> to vector<1x1x512xf32>
    %cst_8 = arith.constant dense<0x7F800000> : vector<1xf32>
    %19 = vector.multi_reduction <minimumf>, %18, %cst_8 [1, 2] : vector<1x1x512xf32> to vector<1xf32>
    %20 = vector.shape_cast %19 : vector<1xf32> to vector<1x1x1xf32>
    %21 = vector.extract %20[0, 0, 0] : f32 from vector<1x1x1xf32>
    %22 = vector.shape_cast %17 : vector<1x512xf32> to vector<1x1x512xf32>
    %cst_9 = arith.constant dense<0xFF800000> : vector<1xf32>
    %23 = vector.multi_reduction <maximumf>, %22, %cst_9 [1, 2] : vector<1x1x512xf32> to vector<1xf32>
    %24 = vector.shape_cast %23 : vector<1xf32> to vector<1x1x1xf32>
    %25 = vector.extract %24[0, 0, 0] : f32 from vector<1x1x1xf32>
    %26 = vector.broadcast %21 : f32 to vector<1x512xf32>
    %27 = arith.subf %17, %26 : vector<1x512xf32>
    %28 = arith.subf %25, %21 : f32
    %cst_10 = arith.constant 9.99999997E-7 : f32
    %29 = arith.addf %28, %cst_10 : f32
    %cst_11 = arith.constant 1.000000e+00 : f32
    %30 = arith.divf %cst_11, %29 : f32
    %31 = vector.broadcast %30 : f32 to vector<1x512xf32>
    %32 = arith.mulf %27, %31 : vector<1x512xf32>
    %c0_12 = arith.constant 0 : index
    %c0_13 = arith.constant 0 : index
    %33 = vector.load %arg6[%c0_12, %c0_13] : memref<1x512xf32, #tpu.memory_space<vmem>>, vector<1x512xf32>
    tpu.vector_store %arg6[%c0_12, %c0_13], %32 {strides = array<i32>} : memref<1x512xf32, #tpu.memory_space<vmem>>, vector<1x512xf32>,
    %c0_14 = arith.constant 0 : index
    %c0_15 = arith.constant 0 : index
    %34 = vector.load %arg2[%c0_14, %c0_15] : memref<1x2048xf32, #tpu.memory_space<vmem>>, vector<1x2048xf32>
    %35 = vector.shape_cast %34 : vector<1x2048xf32> to vector<1x1x2048xf32>
    %cst_16 = arith.constant dense<0x7F800000> : vector<1xf32>
    %36 = vector.multi_reduction <minimumf>, %35, %cst_16 [1, 2] : vector<1x1x2048xf32> to vector<1xf32>
    %37 = vector.shape_cast %36 : vector<1xf32> to vector<1x1x1xf32>
    %38 = vector.extract %37[0, 0, 0] : f32 from vector<1x1x1xf32>
    %39 = vector.shape_cast %34 : vector<1x2048xf32> to vector<1x1x2048xf32>
    %cst_17 = arith.constant dense<0xFF800000> : vector<1xf32>
    %40 = vector.multi_reduction <maximumf>, %39, %cst_17 [1, 2] : vector<1x1x2048xf32> to vector<1xf32>
    %41 = vector.shape_cast %40 : vector<1xf32> to vector<1x1x1xf32>
    %42 = vector.extract %41[0, 0, 0] : f32 from vector<1x1x1xf32>
    %43 = vector.broadcast %38 : f32 to vector<1x2048xf32>
    %44 = arith.subf %34, %43 : vector<1x2048xf32>
    %45 = arith.subf %42, %38 : f32
    %cst_18 = arith.constant 9.99999997E-7 : f32
    %46 = arith.addf %45, %cst_18 : f32
    %cst_19 = arith.constant 1.000000e+00 : f32
    %47 = arith.divf %cst_19, %46 : f32
    %48 = vector.broadcast %47 : f32 to vector<1x2048xf32>
    %49 = arith.mulf %44, %48 : vector<1x2048xf32>
    %c0_20 = arith.constant 0 : index
    %c0_21 = arith.constant 0 : index
    %50 = vector.load %arg7[%c0_20, %c0_21] : memref<1x2048xf32, #tpu.memory_space<vmem>>, vector<1x2048xf32>
    tpu.vector_store %arg7[%c0_20, %c0_21], %49 {strides = array<i32>} : memref<1x2048xf32, #tpu.memory_space<vmem>>, vector<1x2048xf32>,
    %c0_22 = arith.constant 0 : index
    %c0_23 = arith.constant 0 : index
    %51 = vector.load %arg3[%c0_22, %c0_23] : memref<1x512xf32, #tpu.memory_space<vmem>>, vector<1x512xf32>
    %52 = vector.shape_cast %51 : vector<1x512xf32> to vector<1x1x512xf32>
    %cst_24 = arith.constant dense<0x7F800000> : vector<1xf32>
    %53 = vector.multi_reduction <minimumf>, %52, %cst_24 [1, 2] : vector<1x1x512xf32> to vector<1xf32>
    %54 = vector.shape_cast %53 : vector<1xf32> to vector<1x1x1xf32>
    %55 = vector.extract %54[0, 0, 0] : f32 from vector<1x1x1xf32>
    %56 = vector.shape_cast %51 : vector<1x512xf32> to vector<1x1x512xf32>
    %cst_25 = arith.constant dense<0xFF800000> : vector<1xf32>
    %57 = vector.multi_reduction <maximumf>, %56, %cst_25 [1, 2] : vector<1x1x512xf32> to vector<1xf32>
    %58 = vector.shape_cast %57 : vector<1xf32> to vector<1x1x1xf32>
    %59 = vector.extract %58[0, 0, 0] : f32 from vector<1x1x1xf32>
    %60 = vector.broadcast %55 : f32 to vector<1x512xf32>
    %61 = arith.subf %51, %60 : vector<1x512xf32>
    %62 = arith.subf %59, %55 : f32
    %cst_26 = arith.constant 9.99999997E-7 : f32
    %63 = arith.addf %62, %cst_26 : f32
    %cst_27 = arith.constant 1.000000e+00 : f32
    %64 = arith.divf %cst_27, %63 : f32
    %65 = vector.broadcast %64 : f32 to vector<1x512xf32>
    %66 = arith.mulf %61, %65 : vector<1x512xf32>
    %c0_28 = arith.constant 0 : index
    %c0_29 = arith.constant 0 : index
    %67 = vector.load %arg8[%c0_28, %c0_29] : memref<1x512xf32, #tpu.memory_space<vmem>>, vector<1x512xf32>
    tpu.vector_store %arg8[%c0_28, %c0_29], %66 {strides = array<i32>} : memref<1x512xf32, #tpu.memory_space<vmem>>, vector<1x512xf32>,
    %c0_30 = arith.constant 0 : index
    %c0_31 = arith.constant 0 : index
    %68 = vector.load %arg4[%c0_30, %c0_31] : memref<1x2048xf32, #tpu.memory_space<vmem>>, vector<1x2048xf32>
    %69 = vector.shape_cast %68 : vector<1x2048xf32> to vector<1x1x2048xf32>
    %cst_32 = arith.constant dense<0x7F800000> : vector<1xf32>
    %70 = vector.multi_reduction <minimumf>, %69, %cst_32 [1, 2] : vector<1x1x2048xf32> to vector<1xf32>
    %71 = vector.shape_cast %70 : vector<1xf32> to vector<1x1x1xf32>
    %72 = vector.extract %71[0, 0, 0] : f32 from vector<1x1x1xf32>
    %73 = vector.shape_cast %68 : vector<1x2048xf32> to vector<1x1x2048xf32>
    %cst_33 = arith.constant dense<0xFF800000> : vector<1xf32>
    %74 = vector.multi_reduction <maximumf>, %73, %cst_33 [1, 2] : vector<1x1x2048xf32> to vector<1xf32>
    %75 = vector.shape_cast %74 : vector<1xf32> to vector<1x1x1xf32>
    %76 = vector.extract %75[0, 0, 0] : f32 from vector<1x1x1xf32>
    %77 = vector.broadcast %72 : f32 to vector<1x2048xf32>
    %78 = arith.subf %68, %77 : vector<1x2048xf32>
    %79 = arith.subf %76, %72 : f32
    %cst_34 = arith.constant 9.99999997E-7 : f32
    %80 = arith.addf %79, %cst_34 : f32
    %cst_35 = arith.constant 1.000000e+00 : f32
    %81 = arith.divf %cst_35, %80 : f32
    %82 = vector.broadcast %81 : f32 to vector<1x2048xf32>
    %83 = arith.mulf %78, %82 : vector<1x2048xf32>
    %c0_36 = arith.constant 0 : index
    %c0_37 = arith.constant 0 : index
    %84 = vector.load %arg9[%c0_36, %c0_37] : memref<1x2048xf32, #tpu.memory_space<vmem>>, vector<1x2048xf32>
    tpu.vector_store %arg9[%c0_36, %c0_37], %83 {strides = array<i32>} : memref<1x2048xf32, #tpu.memory_space<vmem>>, vector<1x2048xf32>,
    return
  }
}

</mosaic_0001>

<bundles_post_ra>
// kernel: _forward.1
= control target key start
LH: loop header
LB: loop body
LE: loop exit
PB: predicated region body
PF: predicated region fallthrough
CT: control target
= control target key end

     0   :  { %v27_v0 = vlaneseq  ;;  %vm47_vm0 = vcmask 1040384   ;;  %s953_s0 = inlined_call_operand.vmem [shape: f32[1,512], index: 0, kind: input, shape index: {}]   ;;  %s954_s1 = inlined_call_operand.vmem [shape: f32[1,512], index: 1, kind: input, shape index: {}]   ;;  %s955_s2 = inlined_call_operand.vmem [shape: f32[1,2048], index: 2, kind: input, shape index: {}]   ;;  %s956_s3 = inlined_call_operand.vmem [shape: f32[1,512], index: 3, kind: input, shape index: {}]   ;;  %s957_s4 = inlined_call_operand.vmem [shape: f32[1,2048], index: 4, kind: input, shape index: {}]   ;;  %s958_s5 = inlined_call_operand.vmem [shape: f32[1,512], index: 5, kind: output, shape index: {0}]   ;;  %s959_s6 = inlined_call_operand.vmem [shape: f32[1,512], index: 6, kind: output, shape index: {1}]   ;;  %s960_s7 = inlined_call_operand.vmem [shape: f32[1,2048], index: 7, kind: output, shape index: {2}]   ;;  %s961_s8 = inlined_call_operand.vmem [shape: f32[1,512], index: 8, kind: output, shape index: {3}]   ;;  %s962_s9 = inlined_call_operand.vmem [shape: f32[1,2048], index: 9, kind: output, shape index: {4}]  }
   0x1   :  { %v690_v2 = vld [vmem:[%s953_s0] sm:$0xf]  ;;  %v753_v47 = vld [vmem:[%s955_s2 + $0x8] sm:$0xff] }
   0x2   :  { %v28_v1 = vshrl.u32 %v27_v0, 7  ;;  %v703_v7 = vld [vmem:[%s954_s1] sm:$0xf]  ;;  %vm916_vm1 = vcmp.lt.s32.totalorder %v27_v0, 512 }
   0x3   :  { %v743_v36 = vld [vmem:[%s955_s2] sm:$0xff] }
   0x4   :  { %v692_v3 = vsub.s32 0, %v28_v1  ;;  %v694_v4 = vsub.s32 1, %v28_v1  ;;  %v696_v5 = vsub.s32 2, %v28_v1  ;;  %v698_v6 = vsub.s32 3, %v28_v1 }
   0x5   :  { %v705_v8 = vsub.s32 4, %v28_v1  ;;  %v707_v9 = vsub.s32 5, %v28_v1  ;;  %v709_v10 = vsub.s32 6, %v28_v1  ;;  %v711_v11 = vsub.s32 7, %v28_v1 }
   0x6   :  { %v30_v12 = vrot.slane %v690_v2, %v692_v3  ;;  %v34_v13 = vrot.slane %v690_v2, %v694_v4  ;;  %v38_v14 = vrot.slane %v690_v2, %v696_v5  ;;  %v42_v15 = vrot.slane %v690_v2, %v698_v6 }
   0x7   :  { %v99_v16 = vrot.slane %v703_v7, %v692_v3  ;;  %v103_v17 = vrot.slane %v703_v7, %v694_v4  ;;  %v107_v18 = vrot.slane %v703_v7, %v696_v5  ;;  %v111_v19 = vrot.slane %v703_v7, %v698_v6 }
   0x8   :  { %v48_v20 = vsel %vm47_vm0, %v30_v12, inf  ;;  %v49_v21 = vsel %vm47_vm0, %v34_v13, inf  ;;  %v50_v22 = vsel %vm47_vm0, %v38_v14, inf  ;;  %v51_v23 = vsel %vm47_vm0, %v42_v15, inf }
   0x9   :  { %v52_v24 = vmin.f32 %v48_v20, %v49_v21  ;;  %v53_v25 = vmin.f32 %v50_v22, %v51_v23  ;;  %v64_v26 = vsel %vm47_vm0, %v30_v12, -inf  ;;  %v65_v27 = vsel %vm47_vm0, %v34_v13, -inf }
   0xa   :  { %v66_v28 = vsel %vm47_vm0, %v38_v14, -inf  ;;  %v67_v29 = vsel %vm47_vm0, %v42_v15, -inf  ;;  %v68_v30 = vmax.f32 %v64_v26, %v65_v27  ;;  %v116_v31 = vsel %vm47_vm0, %v99_v16, inf }
   0xb   :  { %v54_v32 = vmin.f32 %v52_v24, %v53_v25  ;;  %v69_v33 = vmax.f32 %v66_v28, %v67_v29  ;;  %v117_v34 = vsel %vm47_vm0, %v103_v17, inf  ;;  %v118_v35 = vsel %vm47_vm0, %v107_v18, inf }
   0xc   :  { %v119_v37 = vsel %vm47_vm0, %v111_v19, inf  ;;  %v120_v38 = vmin.f32 %v116_v31, %v117_v34  ;;  %v132_v39 = vsel %vm47_vm0, %v99_v16, -inf  ;;  %v133_v40 = vsel %vm47_vm0, %v103_v17, -inf }
   0xd   :  { %55 = vmin.xlane.f32.xlu0 %v54_v32  ;;  %v70_v41 = vmax.f32 %v68_v30, %v69_v33  ;;  %v121_v42 = vmin.f32 %v118_v35, %v119_v37  ;;  %v134_v43 = vsel %vm47_vm0, %v107_v18, -inf  ;;  %v135_v44 = vsel %vm47_vm0, %v111_v19, -inf }
   0xe   :  { %v136_v45 = vmax.f32 %v132_v39, %v133_v40  ;;  %v137_v46 = vmax.f32 %v134_v43, %v135_v44  ;;  %v165_v48 = vrot.slane %v743_v36, %v692_v3  ;;  %v169_v49 = vrot.slane %v743_v36, %v694_v4 }
   0xf   :  { %v122_v50 = vmin.f32 %v120_v38, %v121_v42  ;;  %v173_v51 = vrot.slane %v743_v36, %v696_v5  ;;  %v177_v52 = vrot.slane %v743_v36, %v698_v6  ;;  %v181_v53 = vrot.slane %v743_v36, %v705_v8 }
  0x10   :  { %v138_v54 = vmax.f32 %v136_v45, %v137_v46  ;;  %v185_v55 = vrot.slane %v743_v36, %v707_v9  ;;  %v189_v56 = vrot.slane %v743_v36, %v709_v10  ;;  %v193_v57 = vrot.slane %v743_v36, %v711_v11 }
  0x11   :  { %71 = vmax.xlane.f32.xlu0 %v70_v41  ;;  %123 = vmin.xlane.f32.xlu1 %v122_v50  ;;  %v197_v58 = vrot.slane %v753_v47, %v692_v3  ;;  %v201_v59 = vrot.slane %v753_v47, %v694_v4  ;;  %v205_v60 = vrot.slane %v753_v47, %v696_v5  ;;  %v282_v61 = vsel %vm47_vm0, %v165_v48, -inf }
  0x12   :  { %v209_v62 = vrot.slane %v753_v47, %v698_v6  ;;  %v213_v63 = vrot.slane %v753_v47, %v705_v8  ;;  %v217_v1 = vrot.slane %v753_v47, %v707_v9  ;;  %v221_v12 = vrot.slane %v753_v47, %v709_v10 }
  0x13   :  { %v225_v13 = vrot.slane %v753_v47, %v711_v11  ;;  %v283_v14 = vsel %vm47_vm0, %v169_v49, -inf  ;;  %v284_v15 = vsel %vm47_vm0, %v173_v51, -inf  ;;  %v285_v16 = vsel %vm47_vm0, %v177_v52, -inf }
  0x14   :  { %v286_v17 = vsel %vm47_vm0, %v181_v53, -inf  ;;  %v288_v18 = vsel %vm47_vm0, %v185_v55, -inf  ;;  %v290_v19 = vsel %vm47_vm0, %v189_v56, -inf  ;;  %v292_v20 = vsel %vm47_vm0, %v193_v57, -inf }
  0x15   :  { %139 = vmax.xlane.f32.xlu1 %v138_v54  ;;  %v287_v21 = vmax.f32 %v282_v61, %v286_v17  ;;  %v289_v22 = vmax.f32 %v283_v14, %v288_v18  ;;  %v291_v23 = vmax.f32 %v284_v15, %v290_v19  ;;  %v293_v24 = vmax.f32 %v285_v16, %v292_v20 }
  0x16   :  { %v294_v25 = vsel %vm47_vm0, %v197_v58, -inf  ;;  %v296_v26 = vsel %vm47_vm0, %v201_v59, -inf  ;;  %v298_v27 = vsel %vm47_vm0, %v205_v60, -inf  ;;  %v300_v28 = vsel %vm47_vm0, %v209_v62, -inf }
  0x17   :  { %v295_v29 = vmax.f32 %v287_v21, %v294_v25  ;;  %v297_v30 = vmax.f32 %v289_v22, %v296_v26  ;;  %v299_v31 = vmax.f32 %v291_v23, %v298_v27  ;;  %v301_v32 = vmax.f32 %v293_v24, %v300_v28 }
  0x18   :  { %v302_v33 = vsel %vm47_vm0, %v213_v63, -inf  ;;  %v304_v34 = vsel %vm47_vm0, %v217_v1, -inf  ;;  %v306_v35 = vsel %vm47_vm0, %v221_v12, -inf  ;;  %v308_v37 = vsel %vm47_vm0, %v225_v13, -inf }
  0x19   :  { %v303_v38 = vmax.f32 %v295_v29, %v302_v33  ;;  %v305_v39 = vmax.f32 %v297_v30, %v304_v34  ;;  %v307_v40 = vmax.f32 %v299_v31, %v306_v35  ;;  %v309_v41 = vmax.f32 %v301_v32, %v308_v37 }
  0x1a   :  { %v242_v42 = vsel %vm47_vm0, %v165_v48, inf  ;;  %v243_v43 = vsel %vm47_vm0, %v169_v49, inf  ;;  %v244_v44 = vsel %vm47_vm0, %v173_v51, inf  ;;  %v245_v45 = vsel %vm47_vm0, %v177_v52, inf }
  0x1b   :  { %v310_v46 = vmax.f32 %v303_v38, %v305_v39  ;;  %v311_v50 = vmax.f32 %v307_v40, %v309_v41  ;;  %v246_v54 = vsel %vm47_vm0, %v181_v53, inf  ;;  %v248_v61 = vsel %vm47_vm0, %v185_v55, inf }
  0x1c   :  { %v247_v14 = vmin.f32 %v242_v42, %v246_v54  ;;  %v249_v15 = vmin.f32 %v243_v43, %v248_v61  ;;  %v250_v16 = vsel %vm47_vm0, %v189_v56, inf  ;;  %v252_v17 = vsel %vm47_vm0, %v193_v57, inf }
  0x1d   :  { %v312_v18 = vmax.f32 %v310_v46, %v311_v50  ;;  %v251_v48 = vmin.f32 %v244_v44, %v250_v16  ;;  %v253_v19 = vmin.f32 %v245_v45, %v252_v17  ;;  %v254_v49 = vsel %vm47_vm0, %v197_v58, inf  ;;  %v843_v44 = vld [vmem:[%s957_s4] sm:$0xff]  ;;  %v848_v45 = vld [vmem:[%s957_s4 + $0x8] sm:$0xff] }
  0x1e   :  { %v255_v51 = vmin.f32 %v247_v14, %v254_v49  ;;  %v256_v52 = vsel %vm47_vm0, %v201_v59, inf  ;;  %v258_v20 = vsel %vm47_vm0, %v205_v60, inf  ;;  %v260_v53 = vsel %vm47_vm0, %v209_v62, inf  ;;  %v822_v62 = vld [vmem:[%s956_s3] sm:$0xf] }
  0x1f   :  { %313 = vmax.xlane.f32.xlu1 %v312_v18  ;;  %v257_v55 = vmin.f32 %v249_v15, %v256_v52  ;;  %v259_v21 = vmin.f32 %v251_v48, %v258_v20  ;;  %v261_v22 = vmin.f32 %v253_v19, %v260_v53  ;;  %v262_v56 = vsel %vm47_vm0, %v213_v63, inf }
  0x20   :  { %v263_v23 = vmin.f32 %v255_v51, %v262_v56  ;;  %v264_v57 = vsel %vm47_vm0, %v217_v1, inf  ;;  %v266_v24 = vsel %vm47_vm0, %v221_v12, inf  ;;  %v268_v58 = vsel %vm47_vm0, %v225_v13, inf }
  0x21   :  { %v265_v25 = vmin.f32 %v257_v55, %v264_v57  ;;  %v267_v26 = vmin.f32 %v259_v21, %v266_v24  ;;  %v269_v59 = vmin.f32 %v261_v22, %v268_v58  ;;  %v340_v63 = vrot.slane %v822_v62, %v692_v3 }
  0x22   :  { %v344_v1 = vrot.slane %v822_v62, %v694_v4  ;;  %v348_v12 = vrot.slane %v822_v62, %v696_v5  ;;  %v352_v13 = vrot.slane %v822_v62, %v698_v6  ;;  %v406_v46 = vrot.slane %v843_v44, %v692_v3 }
  0x23   :  { %v270_v27 = vmin.f32 %v263_v23, %v265_v25  ;;  %v271_v60 = vmin.f32 %v267_v26, %v269_v59  ;;  %v373_v29 = vsel %vm47_vm0, %v340_v63, -inf  ;;  %v357_v35 = vsel %vm47_vm0, %v340_v63, inf }
  0x24   :  { %v374_v30 = vsel %vm47_vm0, %v344_v1, -inf  ;;  %v375_v31 = vsel %vm47_vm0, %v348_v12, -inf  ;;  %v376_v32 = vsel %vm47_vm0, %v352_v13, -inf  ;;  %v358_v37 = vsel %vm47_vm0, %v344_v1, inf }
  0x25   :  { %v272_v28 = vmin.f32 %v270_v27, %v271_v60  ;;  %v377_v33 = vmax.f32 %v373_v29, %v374_v30  ;;  %v378_v34 = vmax.f32 %v375_v31, %v376_v32  ;;  %v359_v38 = vsel %vm47_vm0, %v348_v12, inf }
  0x26   :  { %v360_v39 = vsel %vm47_vm0, %v352_v13, inf  ;;  %v361_v40 = vmin.f32 %v357_v35, %v358_v37  ;;  %v410_v50 = vrot.slane %v843_v44, %v694_v4  ;;  %v414_v54 = vrot.slane %v843_v44, %v696_v5 }
  0x27   :  { %273 = vmin.xlane.f32.xlu0 %v272_v28  ;;  %v379_v41 = vmax.f32 %v377_v33, %v378_v34  ;;  %v362_v42 = vmin.f32 %v359_v38, %v360_v39  ;;  %v418_v61 = vrot.slane %v843_v44, %v698_v6  ;;  %v422_v14 = vrot.slane %v843_v44, %v705_v8 }
  0x28   :  { %v426_v15 = vrot.slane %v843_v44, %v707_v9  ;;  %v430_v16 = vrot.slane %v843_v44, %v709_v10  ;;  %v434_v17 = vrot.slane %v843_v44, %v711_v11  ;;  %v438_v18 = vrot.slane %v848_v45, %v692_v3 }
  0x29   :  { %380 = vmax.xlane.f32.xlu1 %v379_v41  ;;  %v363_v43 = vmin.f32 %v361_v40, %v362_v42  ;;  %v442_v48 = vrot.slane %v848_v45, %v694_v4  ;;  %v446_v19 = vrot.slane %v848_v45, %v696_v5  ;;  %v450_v49 = vrot.slane %v848_v45, %v698_v6 }
  0x2a   :  { %v454_v51 = vrot.slane %v848_v45, %v705_v8  ;;  %v458_v52 = vrot.slane %v848_v45, %v707_v9  ;;  %v462_v20 = vrot.slane %v848_v45, %v709_v10  ;;  %v466_v3 = vrot.slane %v848_v45, %v711_v11 }
  0x2b   :  { %364 = vmin.xlane.f32.xlu0 %v363_v43  ;;  %v523_v4 = vsel %vm47_vm0, %v406_v46, -inf  ;;  %v524_v53 = vsel %vm47_vm0, %v410_v50, -inf  ;;  %v525_v5 = vsel %vm47_vm0, %v414_v54, -inf  ;;  %v526_v6 = vsel %vm47_vm0, %v418_v61, -inf }
  0x2c   :  { %v527_v55 = vsel %vm47_vm0, %v422_v14, -inf  ;;  %v529_v8 = vsel %vm47_vm0, %v426_v15, -inf  ;;  %v531_v9 = vsel %vm47_vm0, %v430_v16, -inf  ;;  %v533_v21 = vsel %vm47_vm0, %v434_v17, -inf }
  0x2d   :  { %v528_v10 = vmax.f32 %v523_v4, %v527_v55  ;;  %v530_v22 = vmax.f32 %v524_v53, %v529_v8  ;;  %v532_v56 = vmax.f32 %v525_v5, %v531_v9  ;;  %v534_v11 = vmax.f32 %v526_v6, %v533_v21 }
  0x2e   :  { %v535_v23 = vsel %vm47_vm0, %v438_v18, -inf  ;;  %v537_v57 = vsel %vm47_vm0, %v442_v48, -inf  ;;  %v539_v24 = vsel %vm47_vm0, %v446_v19, -inf  ;;  %v541_v58 = vsel %vm47_vm0, %v450_v49, -inf }
  0x2f   :  { %v536_v25 = vmax.f32 %v528_v10, %v535_v23  ;;  %v538_v26 = vmax.f32 %v530_v22, %v537_v57  ;;  %v540_v59 = vmax.f32 %v532_v56, %v539_v24  ;;  %v542_v27 = vmax.f32 %v534_v11, %v541_v58 }
  0x30   :  { %v543_v60 = vsel %vm47_vm0, %v454_v51, -inf  ;;  %v545_v28 = vsel %vm47_vm0, %v458_v52, -inf  ;;  %v547_v63 = vsel %vm47_vm0, %v462_v20, -inf  ;;  %v549_v1 = vsel %vm47_vm0, %v466_v3, -inf }
  0x31   :  { %v544_v12 = vmax.f32 %v536_v25, %v543_v60  ;;  %v546_v13 = vmax.f32 %v538_v26, %v545_v28  ;;  %v548_v29 = vmax.f32 %v540_v59, %v547_v63  ;;  %v550_v30 = vmax.f32 %v542_v27, %v549_v1 }
  0x32   :  { %v483_v31 = vsel %vm47_vm0, %v406_v46, inf  ;;  %v484_v32 = vsel %vm47_vm0, %v410_v50, inf  ;;  %v485_v33 = vsel %vm47_vm0, %v414_v54, inf  ;;  %v486_v34 = vsel %vm47_vm0, %v418_v61, inf }
  0x33   :  { %v551_v35 = vmax.f32 %v544_v12, %v546_v13  ;;  %v552_v37 = vmax.f32 %v548_v29, %v550_v30  ;;  %v487_v38 = vsel %vm47_vm0, %v422_v14, inf  ;;  %v489_v39 = vsel %vm47_vm0, %v426_v15, inf }
  0x34   :  { %v488_v40 = vmin.f32 %v483_v31, %v487_v38  ;;  %v490_v41 = vmin.f32 %v484_v32, %v489_v39  ;;  %v491_v42 = vsel %vm47_vm0, %v430_v16, inf  ;;  %v493_v43 = vsel %vm47_vm0, %v434_v17, inf }
  0x35   :  { %v553_v4 = vmax.f32 %v551_v35, %v552_v37  ;;  %v492_v46 = vmin.f32 %v485_v33, %v491_v42  ;;  %v494_v53 = vmin.f32 %v486_v34, %v493_v43  ;;  %v495_v50 = vsel %vm47_vm0, %v438_v18, inf }
  0x36   :  { %v496_v54 = vmin.f32 %v488_v40, %v495_v50  ;;  %v497_v61 = vsel %vm47_vm0, %v442_v48, inf  ;;  %v499_v5 = vsel %vm47_vm0, %v446_v19, inf  ;;  %v501_v14 = vsel %vm47_vm0, %v450_v49, inf }
  0x37   :  { %554 = vmax.xlane.f32.xlu1 %v553_v4  ;;  %v498_v15 = vmin.f32 %v490_v41, %v497_v61  ;;  %v500_v6 = vmin.f32 %v492_v46, %v499_v5  ;;  %v502_v55 = vmin.f32 %v494_v53, %v501_v14  ;;  %v503_v16 = vsel %vm47_vm0, %v454_v51, inf }
  0x38   :  { %v504_v8 = vmin.f32 %v496_v54, %v503_v16  ;;  %v505_v17 = vsel %vm47_vm0, %v458_v52, inf  ;;  %v507_v9 = vsel %vm47_vm0, %v462_v20, inf  ;;  %v509_v18 = vsel %vm47_vm0, %v466_v3, inf }
  0x39   :  { %v506_v21 = vmin.f32 %v498_v15, %v505_v17  ;;  %v508_v10 = vmin.f32 %v500_v6, %v507_v9  ;;  %v510_v48 = vmin.f32 %v502_v55, %v509_v18 }
  0x3b   :  { %v511_v22 = vmin.f32 %v504_v8, %v506_v21  ;;  %v512_v19 = vmin.f32 %v508_v10, %v510_v48 }
  0x3d   :  { %v513_v56 = vmin.f32 %v511_v22, %v512_v19 }
  0x3f   :  { %514 = vmin.xlane.f32.xlu0 %v513_v56 }
  0x9a   :  { %v56_v49 = vpop.xlane.xlu0 %55 }
  0x9b   :  { %v57_v11 = vrot.slane %v56_v49, 4 }
  0x9d   :  { %v58_v23 = vmin.f32 %v56_v49, %v57_v11 }
  0x9e   :  { %v72_v57 = vpop.xlane.xlu0 %71  ;;  %v124_v60 = vpop.xlane.xlu1 %123 }
  0x9f   :  { %v59_v24 = vrot.slane %v58_v23, 2  ;;  %v73_v51 = vrot.slane %v72_v57, 4  ;;  %v125_v63 = vrot.slane %v124_v60, 4 }
  0xa1   :  { %v74_v58 = vmax.f32 %v72_v57, %v73_v51  ;;  %v60_v25 = vmin.f32 %v58_v23, %v59_v24  ;;  %v126_v12 = vmin.f32 %v124_v60, %v125_v63 }
  0xa2   :  { %v140_v28 = vpop.xlane.xlu1 %139 }
  0xa3   :  { %v75_v52 = vrot.slane %v74_v58, 2  ;;  %v61_v26 = vrot.slane %v60_v25, 1  ;;  %v141_v1 = vrot.slane %v140_v28, 4  ;;  %v127_v29 = vrot.slane %v126_v12, 2 }
  0xa5   :  { %v62_v20 = vmin.f32 %v60_v25, %v61_v26  ;;  %v76_v59 = vmax.f32 %v74_v58, %v75_v52  ;;  %v142_v13 = vmax.f32 %v140_v28, %v141_v1  ;;  %v128_v32 = vmin.f32 %v126_v12, %v127_v29 }
  0xa7   :  { %596 = vpush %v62_v20  ;;  %v77_v3 = vrot.slane %v76_v59, 1  ;;  %v143_v30 = vrot.slane %v142_v13, 2  ;;  %v129_v34 = vrot.slane %v128_v32, 1 }
  0xa9   :  { %v78_v27 = vmax.f32 %v76_v59, %v77_v3  ;;  %v144_v33 = vmax.f32 %v142_v13, %v143_v30  ;;  %v130_v38 = vmin.f32 %v128_v32, %v129_v34 }
  0xab   :  { %598 = vpush %v78_v27  ;;  %v145_v35 = vrot.slane %v144_v33, 1 }
  0xac   :  { %v314_v41 = vpop.xlane.xlu1 %313 }
  0xad   :  { %v146_v39 = vmax.f32 %v144_v33, %v145_v35  ;;  %v315_v4 = vrot.slane %v314_v41, 4 }
  0xaf   :  { %v316_v5 = vmax.f32 %v314_v41, %v315_v4 }
  0xb1   :  { %v317_v14 = vrot.slane %v316_v5, 2 }
  0xb3   :  { %v318_v6 = vmax.f32 %v316_v5, %v317_v14 }
  0xb4   :  { %v274_v40 = vpop.xlane.xlu0 %273 }
  0xb5   :  { %v275_v43 = vrot.slane %v274_v40, 4  ;;  %v319_v16 = vrot.slane %v318_v6, 1 }
  0xb6   :  { %v381_v21 = vpop.xlane.xlu1 %380 }
  0xb7   :  { %v276_v54 = vmin.f32 %v274_v40, %v275_v43  ;;  %v320_v9 = vmax.f32 %v318_v6, %v319_v16  ;;  %v382_v22 = vrot.slane %v381_v21, 4 }
  0xb8   :  { %v365_v18 = vpop.xlane.xlu0 %364 }
  0xb9   :  { %v366_v48 = vrot.slane %v365_v18, 4  ;;  %v383_v23 = vmax.f32 %v381_v21, %v382_v22 }
  0xbb   :  { %v367_v49 = vmin.f32 %v365_v18, %v366_v48  ;;  %v384_v24 = vrot.slane %v383_v23, 2 }
  0xbd   :  { %v368_v57 = vrot.slane %v367_v49, 2  ;;  %v385_v58 = vmax.f32 %v383_v23, %v384_v24 }
  0xbf   :  { %v386_v52 = vrot.slane %v385_v58, 1 }
  0xc1   :  { %v387_v59 = vmax.f32 %v385_v58, %v386_v52 }
  0xc4   :  { %v555_v27 = vpop.xlane.xlu1 %554 }
  0xc5   :  { %v556_v63 = vrot.slane %v555_v27, 4 }
  0xc7   :  { %v557_v32 = vmax.f32 %v555_v27, %v556_v63 }
  0xcc   :  { %v515_v3 = vpop.xlane.xlu0 %514 }
  0xcd   :  { %v516_v28 = vrot.slane %v515_v3, 4 }
  0xcf   :  { %v517_v29 = vmin.f32 %v515_v3, %v516_v28 }
  0xd8   :  { %s597_s4 = spop %596 }
  0xd9   :  { %v80_v42 = vstv %s597_s4 }
  0xda   :  { %v81_v46 = vsub.f32 %v690_v2, %v80_v42  ;;  %v277_v2 = vrot.slane %v276_v54, 2 }
  0xdc   :  { %s599_s19 = spop %598  ;;  %v278_v0 = vmin.f32 %v276_v54, %v277_v2 }
  0xdd   :  { %s82_s20 = ssub.f32 %s599_s19, %s597_s4 }
  0xde   :  { %v279_v55 = vrot.slane %v278_v0, 1 }
  0xdf   :  { %s83_s21 = sadd.f32 1e-06, %s82_s20 }
  0xe0   :  { %v280_v17 = vmin.f32 %v278_v0, %v279_v55 }
  0xe1   :  { %v84_v31 = vstv %s83_s21 }
  0xe2   :  { %626 = vrcp.f32 %v84_v31 }
  0xec   :  { %v627_v37 = vpop.eup %626 }
  0xed   :  { %600 = vpush %v627_v37 }
  0xee   :  { %602 = vpush %v130_v38 }
  0xef   :  { %604 = vpush %v146_v39 }
 0x11e   :  { %s601_s22 = spop %600 }
 0x11f   :  { %v87_v53 = vstv %s601_s22  ;;  %s603_s23 = spop %602 }
 0x120   :  { %v88_v61 = vmul.f32 %v87_v53, %v81_v46  ;;  %s605_s24 = spop %604  ;;  %v148_v10 = vstv %s603_s23 }
 0x121   :  { %s150_s25 = ssub.f32 %s605_s24, %s603_s23  ;;  %v149_v19 = vsub.f32 %v703_v7, %v148_v10  ;;  %v369_v7 = vmin.f32 %v367_v49, %v368_v57 }
 0x122   :  { %93 = vst.msk [vmem:[%s958_s5] sm:$0xf] %vm916_vm1, %v88_v61 }
 0x123   :  { %s151_s28 = sadd.f32 1e-06, %s150_s25  ;;  %v370_v25 = vrot.slane %v369_v7, 1 }
 0x125   :  { %v152_v15 = vstv %s151_s28  ;;  %v371_v20 = vmin.f32 %v369_v7, %v370_v25 }
 0x126   :  { %628 = vrcp.f32 %v152_v15 }
 0x130   :  { %v629_v8 = vpop.eup %628 }
 0x131   :  { %606 = vpush %v629_v8 }
 0x132   :  { %608 = vpush %v280_v17 }
 0x133   :  { %610 = vpush %v320_v9 }
 0x162   :  { %s607_s5 = spop %606 }
 0x163   :  { %v155_v56 = vstv %s607_s5  ;;  %s609_s29 = spop %608 }
 0x164   :  { %v156_v11 = vmul.f32 %v155_v56, %v149_v19  ;;  %s611_s30 = spop %610  ;;  %v322_v60 = vstv %s609_s29 }
 0x165   :  { %s325_s10 = ssub.f32 %s611_s30, %s609_s29  ;;  %v323_v1 = vsub.f32 %v743_v36, %v322_v60  ;;  %v324_v12 = vsub.f32 %v753_v47, %v322_v60  ;;  %v518_v36 = vrot.slane %v517_v29, 2  ;;  %v558_v47 = vrot.slane %v557_v32, 2 }
 0x166   :  { %157 = vst.msk [vmem:[%s959_s6] sm:$0xf] %vm916_vm1, %v156_v11 }
 0x167   :  { %s326_s0 = sadd.f32 1e-06, %s325_s10  ;;  %v519_v34 = vmin.f32 %v517_v29, %v518_v36  ;;  %v559_v35 = vmax.f32 %v557_v32, %v558_v47 }
 0x169   :  { %v327_v51 = vstv %s326_s0  ;;  %v520_v37 = vrot.slane %v519_v34, 1  ;;  %v560_v38 = vrot.slane %v559_v35, 1 }
 0x16a   :  { %630 = vrcp.f32 %v327_v51 }
 0x16b   :  { %v521_v40 = vmin.f32 %v519_v34, %v520_v37  ;;  %v561_v41 = vmax.f32 %v559_v35, %v560_v38 }
 0x174   :  { %v631_v26 = vpop.eup %630 }
 0x175   :  { %612 = vpush %v631_v26 }
 0x176   :  { %614 = vpush %v371_v20 }
 0x177   :  { %616 = vpush %v387_v59 }
 0x1a6   :  { %s613_s6 = spop %612 }
 0x1a7   :  { %v330_v13 = vstv %s613_s6  ;;  %s615_s1 = spop %614 }
 0x1a8   :  { %v331_v30 = vmul.f32 %v330_v13, %v323_v1  ;;  %v332_v31 = vmul.f32 %v330_v13, %v324_v12  ;;  %s617_s13 = spop %616  ;;  %v389_v42 = vstv %s615_s1 }
 0x1a9   :  { %s391_s14 = ssub.f32 %s617_s13, %s615_s1  ;;  %v390_v43 = vsub.f32 %v822_v62, %v389_v42 }
 0x1aa   :  { %333 = vst [vmem:[%s960_s7] sm:$0xff] %v331_v30  ;;  %334 = vst [vmem:[%s960_s7 + $0x8] sm:$0xff] %v332_v31 }
 0x1ab   :  { %s392_s17 = sadd.f32 1e-06, %s391_s14 }
 0x1ad   :  { %v393_v33 = vstv %s392_s17 }
 0x1ae   :  { %632 = vrcp.f32 %v393_v33 }
 0x1b8   :  { %v633_v39 = vpop.eup %632 }
 0x1b9   :  { %618 = vpush %v633_v39 }
 0x1ba   :  { %620 = vpush %v521_v40 }
 0x1bb   :  { %622 = vpush %v561_v41 }
 0x1ea   :  { %s619_s18 = spop %618 }
 0x1eb   :  { %v396_v4 = vstv %s619_s18  ;;  %s621_s7 = spop %620 }
 0x1ec   :  { %v397_v46 = vmul.f32 %v396_v4, %v390_v43  ;;  %s623_s4 = spop %622  ;;  %v563_v61 = vstv %s621_s7 }
 0x1ed   :  { %s566_s19 = ssub.f32 %s623_s4, %s621_s7  ;;  %v564_v62 = vsub.f32 %v843_v44, %v563_v61  ;;  %v565_v5 = vsub.f32 %v848_v45, %v563_v61 }
 0x1ee   :  { %398 = vst.msk [vmem:[%s961_s8] sm:$0xf] %vm916_vm1, %v397_v46 }
 0x1ef   :  { %s567_s22 = sadd.f32 1e-06, %s566_s19 }
 0x1f1   :  { %v568_v53 = vstv %s567_s22 }
 0x1f2   :  { %634 = vrcp.f32 %v568_v53 }
 0x1fc   :  { %v635_v54 = vpop.eup %634 }
 0x1fd   :  { %624 = vpush %v635_v54 }
 0x22e   :  { %s625_s23 = spop %624 }
 0x22f   :  { %v571_v2 = vstv %s625_s23 }
 0x230   :  { %v572_v14 = vmul.f32 %v571_v2, %v564_v62  ;;  %v573_v15 = vmul.f32 %v571_v2, %v565_v5 }
 0x232   :  { %574 = vst [vmem:[%s962_s9] sm:$0xff] %v572_v14  ;;  %575 = vst [vmem:[%s962_s9 + $0x8] sm:$0xff] %v573_v15 }

</bundles_post_ra>
